<compile_context>
chip_gen: v5e
topology: v5e:2x2
jax: 0.10.0
libtpu: 0.0.40
codegen_flags: <defaults>
</compile_context>

<pallas_src>
import functools

import jax
import jax.numpy as jnp
from jax import lax
from jax.experimental import pallas as pl
from jax.experimental.pallas import tpu as pltpu


def _basic_conv2d_kernel(x_ref, w_ref, b_ref, o_ref, *, H):
    """One grid step = one block of images with their rows flattened into M.

    x_ref : (M, (W+2)*Cin)           M = batch_block*H un-H-padded rows, W-padded lanes
    w_ref : (3, (W+2)*Cin, W*Cout)   banded conv weight (1x1 + BN scale folded), one band per dy
    b_ref : (1, W*Cout)              folded BN bias, tiled across W (f32)
    o_ref : (M, W*Cout)              lane-dense output rows
    """
    x = x_ref[...]                       # aligned, read once, reused by all 3 matmuls
    M, NW = o_ref.shape

    # Three full-M MXU matmuls, one per kernel row dy (the dx taps live inside the
    # banded weight's K dimension, so no im2col / LHS slicing is needed).
    y0 = jnp.dot(x, w_ref[0], preferred_element_type=jnp.float32)   # wants input row h-1
    y1 = jnp.dot(x, w_ref[1], preferred_element_type=jnp.float32)   # center row h
    y2 = jnp.dot(x, w_ref[2], preferred_element_type=jnp.float32)   # wants input row h+1

    # In-kernel H halo: shift the dy=0 / dy=2 results by +-1 row (XLU sublane roll,
    # off the MXU/VPU critical path) and zero contributions crossing image boundaries.
    h = lax.broadcasted_iota(jnp.int32, (M, NW), 0) % H              # row index within image
    up = jnp.where(h == 0, 0.0, pltpu.roll(y0, 1, axis=0))           # y0[r-1]
    dn = jnp.where(h == H - 1, 0.0, pltpu.roll(y2, M - 1, axis=0))   # y2[r+1]

    # Folded-BN bias + ReLU epilogue, full-lane-width store (bf16 on the perf path).
    y = y1 + up + dn + b_ref[...]
    o_ref[...] = jnp.maximum(y, 0.0).astype(o_ref.dtype)


def prepare_basic_conv2d_params(w1, w3, gamma, beta, running_mean, running_var, W,
                                eps=1e-5, compute_dtype=jnp.bfloat16):
    """Fold BN (inference) + 1x1 conv into a banded 3x3 weight.  Call ONCE at load time.

    w1: (Cout, Cin, 1, 1)   w3: (Cout, Cin, 3, 3)
    Returns (wband: (3, (W+2)*Cin, W*Cout) in compute_dtype, bias_row: (1, W*Cout) f32).
    """
    Cout, Cin = w3.shape[0], w3.shape[1]

    scale = (gamma / jnp.sqrt(running_var + eps)).astype(jnp.float32)      # (Cout,)
    bias = (beta - running_mean * scale).astype(jnp.float32)               # (Cout,)

    w3f = jnp.transpose(w3, (2, 3, 1, 0)).astype(jnp.float32)              # (3,3,Cin,Cout)
    w1f = jnp.transpose(w1[:, :, 0, 0], (1, 0)).astype(jnp.float32)        # (Cin,Cout)
    w3f = w3f.at[1, 1].add(w1f)                                            # fold 1x1 into center tap
    w3f = w3f * scale.reshape(1, 1, 1, Cout)                               # fold BN scale

    # Banded ("Toeplitz") weight: band[dy][(w+dx)*Cin + c, w*Cout + co] = w3f[dy, dx, c, co].
    # Density 3/(W+2): only sensible for small channel counts / W (see TODO above).
    eye_w = jnp.eye(W, dtype=jnp.float32)
    bands = []
    for dy in range(3):
        band = jnp.zeros(((W + 2) * Cin, W * Cout), jnp.float32)
        for dx in range(3):
            shift = jnp.zeros((W + 2, W), jnp.float32).at[dx:dx + W, :].set(eye_w)
            band = band + jnp.einsum('pq,co->pcqo', shift, w3f[dy, dx]
                                     ).reshape((W + 2) * Cin, W * Cout)
        bands.append(band)
    wband = jnp.stack(bands, axis=0).astype(compute_dtype)

    bias_row = jnp.tile(bias.reshape(1, Cout), (1, W))                     # (1, W*Cout)
    return wband, bias_row


def _pick_batch_block(N, H, target_rows=256):
    """Largest divisor of N with block rows <= target, preferring >= 2 grid steps (v7x)."""
    b = max(1, min(N, max(1, target_rows // max(H, 1))))
    while N % b:
        b -= 1
    if N // b < 2 and b % 2 == 0:
        b //= 2                       # keep both v7x TensorCores busy when possible
    if (b * H) % 8 != 0:
        b = N                         # (8,128) rule: block rows multiple of 8 or full extent
    return b


def basic_conv2d_nhwc(x_nhwc, wband, bias_row, *, batch_block=None):
    """Fast path: NHWC in, NHWC out.  wband/bias_row come from prepare_basic_conv2d_params."""
    N, H, W, Cin = x_nhwc.shape
    K = (W + 2) * Cin
    NW = bias_row.shape[-1]
    Cout = NW // W
    cdt = wband.dtype

    if batch_block is None:
        batch_block = _pick_batch_block(N, H)
    assert N % batch_block == 0
    Mb = batch_block * H

    # Pad only the W axis; flatten (N,H) -> rows and (W+2,Cin) -> lanes (free reshapes).
    xw = jnp.pad(x_nhwc, ((0, 0), (0, 0), (1, 1), (0, 0)))
    xw = xw.reshape(N * H, K).astype(cdt)

    itemsize = jnp.dtype(cdt).itemsize
    cost = pl.CostEstimate(
        flops=2 * (N * H) * K * NW * 3,
        transcendentals=0,
        bytes_accessed=(N * H * K * itemsize + 3 * K * NW * itemsize
                        + NW * 4 + N * H * NW * itemsize))

    out = pl.pallas_call(
        functools.partial(_basic_conv2d_kernel, H=H),
        out_shape=jax.ShapeDtypeStruct((N * H, NW), cdt),
        grid_spec=pltpu.PrefetchScalarGridSpec(
            num_scalar_prefetch=0,
            grid=(N // batch_block,),
            in_specs=[
                pl.BlockSpec((Mb, K), lambda n: (n, 0)),
                pl.BlockSpec((3, K, NW), lambda n: (0, 0, 0)),
                pl.BlockSpec((1, NW), lambda n: (0, 0)),
            ],
            out_specs=pl.BlockSpec((Mb, NW), lambda n: (n, 0)),
        ),
        compiler_params=pltpu.CompilerParams(
            dimension_semantics=("parallel",)),
        cost_estimate=cost,
    )(xw, wband, bias_row)

    return out.reshape(N, H, W, Cout)


def basic_conv2d_nchw(x_nchw, wband, bias_row, *, batch_block=None):
    """PyTorch-layout compatibility wrapper (relayouts live only here)."""
    x = jnp.transpose(x_nchw, (0, 2, 3, 1))
    y = basic_conv2d_nhwc(x, wband, bias_row, batch_block=batch_block)
    return jnp.transpose(y, (0, 3, 1, 2))


def _reference(x_nchw, w1, w3, gamma, beta, running_mean, running_var, eps=1e-5):
    dn1 = lax.conv_dimension_numbers(x_nchw.shape, w1.shape, ("NCHW", "OIHW", "NCHW"))
    x1 = lax.conv_general_dilated(x_nchw, w1, (1, 1), "VALID", dimension_numbers=dn1)
    dn3 = lax.conv_dimension_numbers(x_nchw.shape, w3.shape, ("NCHW", "OIHW", "NCHW"))
    x3 = lax.conv_general_dilated(x_nchw, w3, (1, 1), ((1, 1), (1, 1)),
                                  dimension_numbers=dn3)
    s = x1 + x3
    scale = (gamma / jnp.sqrt(running_var + eps)).reshape(1, -1, 1, 1)
    bias = (beta - running_mean * gamma / jnp.sqrt(running_var + eps)).reshape(1, -1, 1, 1)
    return jnp.maximum(s * scale + bias, 0.0)


if __name__ == "__main__":
    key = jax.random.PRNGKey(0)
    N, Cin, Cout, H, W = 16, 4, 8, 16, 16        # batch_block=8 -> M=128 rows, 2 grid steps

    k_x, k_w1, k_w3, k_g, k_m, k_v = jax.random.split(key, 6)
    x = jax.random.normal(k_x, (N, Cin, H, W), dtype=jnp.float32)

    # kaiming-normal style init (fan_out), deterministic.
    std1 = (2.0 / (Cout * 1 * 1)) ** 0.5
    std3 = (2.0 / (Cout * 3 * 3)) ** 0.5
    w1 = std1 * jax.random.normal(k_w1, (Cout, Cin, 1, 1), dtype=jnp.float32)
    w3 = std3 * jax.random.normal(k_w3, (Cout, Cin, 3, 3), dtype=jnp.float32)

    # BN params (inference running stats made non-trivial to exercise the fold).
    gamma = 1.0 + 0.01 * jax.random.normal(k_g, (Cout,), dtype=jnp.float32)
    beta = jnp.zeros((Cout,), dtype=jnp.float32)
    running_mean = 0.1 * jax.random.normal(k_m, (Cout,), dtype=jnp.float32)
    running_var = 1.0 + 0.1 * jax.random.uniform(k_v, (Cout,), dtype=jnp.float32)

    ref = _reference(x, w1, w3, gamma, beta, running_mean, running_var)

    apply_nchw = jax.jit(basic_conv2d_nchw)

    # f32 path: tight correctness check of conv / band / in-kernel halo / BN-fold / ReLU.
    wband32, bias_row = prepare_basic_conv2d_params(
        w1, w3, gamma, beta, running_mean, running_var, W, compute_dtype=jnp.float32)
    out_f32 = apply_nchw(x, wband32, bias_row)
    jax.block_until_ready(out_f32)
    assert out_f32.shape == (N, Cout, H, W)
    assert jnp.allclose(out_f32.astype(jnp.float32), ref, atol=1e-3, rtol=1e-3)

    # bf16-in / f32-accumulate / bf16-out path (the performance configuration).
    wband16, bias_row16 = prepare_basic_conv2d_params(
        w1, w3, gamma, beta, running_mean, running_var, W, compute_dtype=jnp.bfloat16)
    out_bf16 = apply_nchw(x, wband16, bias_row16)
    jax.block_until_ready(out_bf16)
    assert out_bf16.shape == (N, Cout, H, W)
    assert jnp.allclose(out_bf16.astype(jnp.float32), ref, atol=6e-2, rtol=6e-2)

    print("KERNEL_OK")
</pallas_src>

<mosaic_0001>
module attributes {stable_mosaic.version = 11 : i64} {
  func.func @_basic_conv2d_kernel(%arg0: i32, %arg1: memref<128x72xf32, #tpu.memory_space<vmem>>, %arg2: memref<3x72x128xf32, #tpu.memory_space<vmem>>, %arg3: memref<1x128xf32, #tpu.memory_space<vmem>>, %arg4: memref<128x128xf32, #tpu.memory_space<vmem>>) attributes {dimension_semantics = [#tpu.dimension_semantics<parallel>], iteration_bounds = array<i64: 2>, scalar_prefetch = 0 : i64, scratch_operands = 0 : i64, tpu.core_type = #tpu.core_type<tc>, window_params = [{transform_indices = @transform_0, window_bounds = array<i64: 128, 72>}, {pipeline_mode = #tpu.pipeline_mode<synchronous>, transform_indices = @transform_1, window_bounds = array<i64: 3, 72, 128>}, {pipeline_mode = #tpu.pipeline_mode<synchronous>, transform_indices = @transform_2, window_bounds = array<i64: 1, 128>}, {transform_indices = @transform_3, window_bounds = array<i64: 128, 128>}]} {
    %c0 = arith.constant 0 : index
    %c0_0 = arith.constant 0 : index
    %0 = vector.load %arg1[%c0, %c0_0] : memref<128x72xf32, #tpu.memory_space<vmem>>, vector<128x72xf32>
    %c0_1 = arith.constant 0 : index
    %c0_2 = arith.constant 0 : index
    %c0_3 = arith.constant 0 : index
    %1 = vector.load %arg2[%c0_1, %c0_2, %c0_3] : memref<3x72x128xf32, #tpu.memory_space<vmem>>, vector<1x72x128xf32>
    %2 = vector.shape_cast %1 : vector<1x72x128xf32> to vector<72x128xf32>
    %cst = arith.constant dense<0.000000e+00> : vector<128x128xf32>
    %3 = tpu.matmul %0, %2, %cst {dimension_numbers = #tpu.dot_dimension_numbers<[1], [0], [0], [1], [0, 0, 1, 1], [], []>} : vector<128x72xf32>, vector<72x128xf32>, vector<128x128xf32> -> vector<128x128xf32>
    %c1 = arith.constant 1 : index
    %c0_4 = arith.constant 0 : index
    %c0_5 = arith.constant 0 : index
    %4 = vector.load %arg2[%c1, %c0_4, %c0_5] : memref<3x72x128xf32, #tpu.memory_space<vmem>>, vector<1x72x128xf32>
    %5 = vector.shape_cast %4 : vector<1x72x128xf32> to vector<72x128xf32>
    %cst_6 = arith.constant dense<0.000000e+00> : vector<128x128xf32>
    %6 = tpu.matmul %0, %5, %cst_6 {dimension_numbers = #tpu.dot_dimension_numbers<[1], [0], [0], [1], [0, 0, 1, 1], [], []>} : vector<128x72xf32>, vector<72x128xf32>, vector<128x128xf32> -> vector<128x128xf32>
    %c2 = arith.constant 2 : index
    %c0_7 = arith.constant 0 : index
    %c0_8 = arith.constant 0 : index
    %7 = vector.load %arg2[%c2, %c0_7, %c0_8] : memref<3x72x128xf32, #tpu.memory_space<vmem>>, vector<1x72x128xf32>
    %8 = vector.shape_cast %7 : vector<1x72x128xf32> to vector<72x128xf32>
    %cst_9 = arith.constant dense<0.000000e+00> : vector<128x128xf32>
    %9 = tpu.matmul %0, %8, %cst_9 {dimension_numbers = #tpu.dot_dimension_numbers<[1], [0], [0], [1], [0, 0, 1, 1], [], []>} : vector<128x72xf32>, vector<72x128xf32>, vector<128x128xf32> -> vector<128x128xf32>
    %10 = tpu.iota {dimensions = array<i32: 0>} : vector<128x128xi32>
    %c16_i32 = arith.constant 16 : i32
    %c0_i32 = arith.constant 0 : i32
    %11 = arith.cmpi eq, %c16_i32, %c0_i32 : i32
    %c1_i32 = arith.constant 1 : i32
    %12 = arith.select %11, %c1_i32, %c16_i32 : i32
    %13 = vector.broadcast %12 : i32 to vector<128x128xi32>
    %14 = arith.remsi %10, %13 : vector<128x128xi32>
    %c0_i32_10 = arith.constant 0 : i32
    %15 = vector.broadcast %c0_i32_10 : i32 to vector<128x128xi32>
    %16 = arith.cmpi ne, %14, %15 : vector<128x128xi32>
    %c0_i32_11 = arith.constant 0 : i32
    %17 = vector.broadcast %c0_i32_11 : i32 to vector<128x128xi32>
    %18 = arith.cmpi slt, %14, %17 : vector<128x128xi32>
    %c0_i32_12 = arith.constant 0 : i32
    %19 = arith.cmpi slt, %12, %c0_i32_12 : i32
    %20 = vector.broadcast %19 : i1 to vector<128x128xi1>
    %21 = vector.broadcast %20 : vector<128x128xi1> to vector<128x128xi1>
    %22 = arith.xori %18, %21 : vector<128x128xi1>
    %23 = arith.andi %22, %16 : vector<128x128xi1>
    %24 = vector.broadcast %12 : i32 to vector<128x128xi32>
    %25 = arith.addi %14, %24 : vector<128x128xi32>
    %26 = arith.select %23, %25, %14 : vector<128x128xi1>, vector<128x128xi32>
    %c0_i32_13 = arith.constant 0 : i32
    %27 = vector.broadcast %c0_i32_13 : i32 to vector<128x128xi32>
    %28 = arith.cmpi eq, %26, %27 : vector<128x128xi32>
    %c1_i32_14 = arith.constant 1 : i32
    %29 = tpu.dynamic_rotate %3 by %c1_i32_14 dim 0 : vector<128x128xf32>, i32 -> vector<128x128xf32>
    %cst_15 = arith.constant 0.000000e+00 : f32
    %30 = vector.broadcast %cst_15 : f32 to vector<128x128xf32>
    %31 = arith.select %28, %30, %29 : vector<128x128xi1>, vector<128x128xf32>
    %c15_i32 = arith.constant 15 : i32
    %32 = vector.broadcast %c15_i32 : i32 to vector<128x128xi32>
    %33 = arith.cmpi eq, %26, %32 : vector<128x128xi32>
    %c127_i32 = arith.constant 127 : i32
    %34 = tpu.dynamic_rotate %9 by %c127_i32 dim 0 : vector<128x128xf32>, i32 -> vector<128x128xf32>
    %cst_16 = arith.constant 0.000000e+00 : f32
    %35 = vector.broadcast %cst_16 : f32 to vector<128x128xf32>
    %36 = arith.select %33, %35, %34 : vector<128x128xi1>, vector<128x128xf32>
    %37 = arith.addf %6, %31 : vector<128x128xf32>
    %38 = arith.addf %37, %36 : vector<128x128xf32>
    %c0_17 = arith.constant 0 : index
    %c0_18 = arith.constant 0 : index
    %39 = vector.load %arg3[%c0_17, %c0_18] : memref<1x128xf32, #tpu.memory_space<vmem>>, vector<1x128xf32>
    %40 = vector.broadcast %39 : vector<1x128xf32> to vector<128x128xf32>
    %41 = arith.addf %38, %40 : vector<128x128xf32>
    %cst_19 = arith.constant 0.000000e+00 : f32
    %42 = vector.broadcast %cst_19 : f32 to vector<128x128xf32>
    %43 = arith.maximumf %41, %42 : vector<128x128xf32>
    %c0_20 = arith.constant 0 : index
    %c0_21 = arith.constant 0 : index
    %44 = vector.load %arg4[%c0_20, %c0_21] : memref<128x128xf32, #tpu.memory_space<vmem>>, vector<128x128xf32>
    tpu.vector_store %arg4[%c0_20, %c0_21], %43 {strides = array<i32>} : memref<128x128xf32, #tpu.memory_space<vmem>>, vector<128x128xf32>,
    return
  }
  func.func @transform_0(%arg0: i32) -> (i32, i32) {
    %c0_i32 = arith.constant 0 : i32
    %c0_i32_0 = arith.constant 0 : i32
    return %arg0, %c0_i32 : i32, i32
  }
  func.func @transform_1(%arg0: i32) -> (i32, i32, i32) {
    %c0_i32 = arith.constant 0 : i32
    %c0_i32_0 = arith.constant 0 : i32
    %c0_i32_1 = arith.constant 0 : i32
    %c0_i32_2 = arith.constant 0 : i32
    return %c0_i32, %c0_i32_0, %c0_i32_1 : i32, i32, i32
  }
  func.func @transform_2(%arg0: i32) -> (i32, i32) {
    %c0_i32 = arith.constant 0 : i32
    %c0_i32_0 = arith.constant 0 : i32
    %c0_i32_1 = arith.constant 0 : i32
    return %c0_i32, %c0_i32_0 : i32, i32
  }
  func.func @transform_3(%arg0: i32) -> (i32, i32) {
    %c0_i32 = arith.constant 0 : i32
    %c0_i32_0 = arith.constant 0 : i32
    return %arg0, %c0_i32 : i32, i32
  }
}

</mosaic_0001>

<bundles_post_ra>
// kernel: basic_conv2d_nchw.1
= control target key start
LH: loop header
LB: loop body
LE: loop exit
PB: predicated region body
PF: predicated region fallthrough
CT: control target
= control target key end

     0   :  { %s1067_s12 = smov 0   ;;  %s1491_s0 = inlined_call_operand.vmem [shape: f32[256,72], index: 0, kind: input, shape index: {}]   ;;  %s1492_s1 = inlined_call_operand.vmem [shape: f32[3,72,128], index: 1, kind: input, shape index: {}]   ;;  %s1493_s2 = inlined_call_operand.vmem [shape: f32[1,128], index: 2, kind: input, shape index: {}]   ;;  %s1494_s3 = inlined_call_operand.vmem [shape: f32[256,128], index: 3, kind: output, shape index: {}]  }
   0x1 LB: > { %s926_s13 = sadd.s32 4294967295, %s1045_s12   ;;  %p930_p0 = scmp.ge.s32.totalorder %s1045_s12, 1  ;;  %s1045_s12 = sphi %s1067_s12, %s13_s12  }
   0x2   : > { %p138_p1 = scmp.lt.s32.totalorder %s1045_s12, 3 }
   0x4   : > { %p139_p2 = pnand %p930_p0, %p138_p1 }
   0x5   : > { %s931_s20 = sshll.u32 (!%p139_p2), %s926_s13, 4 }
   0x6   : > { %142 = sbr.rel (%p139_p2) target bundleno = 261 (0x105), region = 32  ;;  %p163_p3 = scmp.lt.s32.totalorder (!%p139_p2), %s931_s20, 31 }
   0xb   : > { %v198_v0 = vld [vmem:[%s1492_s1 + $0x40] sm:$0xff]  ;;  %v1081_v1 = vld [vmem:[%s1492_s1 + $0xd0] sm:$0xff]  ;;  %v1086_v2 = vld [vmem:[%s1492_s1 + $0x88] sm:$0xff]  ;;  %s1508_s20 = smov (!%p163_p3, %s931_s20), 31  ;;  %vm199_vm0 = vcmask 588800   ;;  %v398_v45 = vlaneseq }
   0xc   : > { %255 = vmatpush.msra.mxu0 %v198_v0  ;;  %1003 = vmatpush.msra.mxu3 %v198_v0  ;;  %v197_v3 = vld [vmem:[%s1492_s1 + $0x38] sm:$0xff]  ;;  %v1094_v4 = vld [vmem:[%s1492_s1 + $0xc8] sm:$0xff]  ;;  %v1099_v5 = vld [vmem:[%s1492_s1 + $0x80] sm:$0xff]  ;;  %s932_s28 = sshll.u32 %s1508_s20, 3 }
   0xd   : > { %340 = vmatpush.msra.mxu1 %v1081_v1  ;;  %744 = vmatpush.msra.mxu2 %v1086_v2  ;;  %v196_v6 = vld [vmem:[%s1492_s1 + $0x30] sm:$0xff]  ;;  %v1109_v7 = vld [vmem:[%s1492_s1 + $0xc0] sm:$0xff]  ;;  %v1114_v8 = vld [vmem:[%s1492_s1 + $0x78] sm:$0xff]  ;;  %s1183_s15 = scalar_lea.vmem %s1491_s0, %s932_s28  ;;  %v1276_v49 = vshrl.u32 %v398_v45, 7  ;;  %s1306_s27 = scalar_lea.vmem %s1494_s3, %s932_s28 }
   0xe   : > { %256 = vmatpush.msra.mxu0 %v197_v3  ;;  %1004 = vmatpush.msra.mxu3 %v197_v3  ;;  %v195_v9 = vld [vmem:[%s1492_s1 + $0x28] sm:$0xff]  ;;  %v965_v10 = vld [vmem:[%s1492_s1 + $0xb8] sm:$0xff]  ;;  %v1127_v11 = vld [vmem:[%s1492_s1 + $0x70] sm:$0xff] }
   0xf   : > { %341 = vmatpush.msra.mxu1 %v1094_v4  ;;  %745 = vmatpush.msra.mxu2 %v1099_v5  ;;  %v194_v12 = vld [vmem:[%s1492_s1 + $0x20] sm:$0xff]  ;;  %v964_v13 = vld [vmem:[%s1492_s1 + $0xb0] sm:$0xff]  ;;  %v1143_v14 = vld [vmem:[%s1492_s1 + $0x68] sm:$0xff]  ;;  %v400_v51 = vadd.s32 8, %v1276_v49  ;;  %v401_v55 = vadd.s32 16, %v1276_v49  ;;  %vm639_vm1 = vcmp.lt.s32.totalorder %v1276_v49, 1 }
  0x10   : > { %257 = vmatpush.msra.mxu0 %v196_v6  ;;  %1005 = vmatpush.msra.mxu3 %v196_v6  ;;  %v193_v15 = vld [vmem:[%s1492_s1 + $0x18] sm:$0xff]  ;;  %v963_v16 = vld [vmem:[%s1492_s1 + $0xa8] sm:$0xff]  ;;  %v1155_v17 = vld [vmem:[%s1492_s1 + $0x60] sm:$0xff]  ;;  %vm704_vm3 = vcmp.lt.s32.totalorder %v1276_v49, 7 }
  0x11   : > { %342 = vmatpush.msra.mxu1 %v1109_v7  ;;  %746 = vmatpush.msra.mxu2 %v1114_v8  ;;  %v192_v18 = vld [vmem:[%s1492_s1 + $0x10] sm:$0xff]  ;;  %v962_v19 = vld [vmem:[%s1492_s1 + $0xa0] sm:$0xff]  ;;  %v953_v20 = vld [vmem:[%s1492_s1 + $0x58] sm:$0xff]  ;;  %v426_v53 = vand.u32 15, %v400_v51  ;;  %v433_v0 = vand.u32 15, %v401_v55 }
  0x12   : > { %258 = vmatpush.msra.mxu0 %v195_v9  ;;  %1006 = vmatpush.msra.mxu3 %v195_v9  ;;  %v191_v21 = vld [vmem:[%s1492_s1 + $0x8] sm:$0xff]  ;;  %v961_v22 = vld [vmem:[%s1492_s1 + $0x98] sm:$0xff]  ;;  %v952_v23 = vld [vmem:[%s1492_s1 + $0x50] sm:$0xff] }
  0x13   : > { %343 = vmatpush.msra.mxu1 %v965_v10  ;;  %747 = vmatpush.msra.mxu2 %v1127_v11  ;;  %v190_v24 = vld [vmem:[%s1492_s1] sm:$0xff]  ;;  %v960_v25 = vld [vmem:[%s1492_s1 + $0x90] sm:$0xff]  ;;  %v951_v26 = vld [vmem:[%s1492_s1 + $0x48] sm:$0xff]  ;;  %vm673_vm2 = vcmp.eq.s32.totalorder %v426_v53, 15  ;;  %vm609_vm4 = vcmp.eq.s32.totalorder %v433_v0, 0 }
  0x14   : > { %259 = vmatpush.msra.mxu0 %v194_v12  ;;  %1007 = vmatpush.msra.mxu3 %v194_v12  ;;  %v174_v27 = vld [vmem:[%s1183_s15] sm:$0xff]  ;;  %v175_v29 = vld [vmem:[%s1183_s15 + $0x8] sm:$0xff]  ;;  %v176_v31 = vld [vmem:[%s1183_s15 + $0x10] sm:$0xff] }
  0x15   : > { %344 = vmatpush.msra.mxu1 %v964_v13  ;;  %748 = vmatpush.msra.mxu2 %v1143_v14  ;;  %v1196_v28 = vld [vmem:[%s1183_s15 + $0x60] sm:$0xff]  ;;  %v187_v30 = vld [vmem:[%s1183_s15 + $0x68] sm:$0xff]  ;;  %v188_v32 = vld [vmem:[%s1183_s15 + $0x70] sm:$0xff] }
  0x16   : > { %260 = vmatpush.msra.mxu0 %v193_v15  ;;  %1008 = vmatpush.msra.mxu3 %v193_v15  ;;  %v177_v33 = vld [vmem:[%s1183_s15 + $0x18] sm:$0xff]  ;;  %v178_v35 = vld [vmem:[%s1183_s15 + $0x20] sm:$0xff]  ;;  %v179_v36 = vld [vmem:[%s1183_s15 + $0x28] sm:$0xff]  ;;  %v402_v15 = vadd.s32 24, %v1276_v49 }
  0x17   : > { %345 = vmatpush.msra.mxu1 %v963_v16  ;;  %749 = vmatpush.msra.mxu2 %v1155_v17  ;;  %v189_v34 = vld [vmem:[%s1183_s15 + $0x78] sm:$0xff]  ;;  %v180_v37 = vld [vmem:[%s1183_s15 + $0x30] sm:$0xff]  ;;  %v182_v39 = vld [vmem:[%s1183_s15 + $0x40] sm:$0xff] }
  0x18   : > { %261 = vmatpush.msra.mxu0 %v192_v18  ;;  %1009 = vmatpush.msra.mxu3 %v192_v18  ;;  %v181_v38 = vld [vmem:[%s1183_s15 + $0x38] sm:$0xff]  ;;  %v183_v40 = vld [vmem:[%s1183_s15 + $0x48] sm:$0xff]  ;;  %v184_v41 = vld [vmem:[%s1183_s15 + $0x50] sm:$0xff] }
  0x19   : > { %346 = vmatpush.msra.mxu1 %v962_v19  ;;  %750 = vmatpush.msra.mxu2 %v953_v20  ;;  %v185_v42 = vld [vmem:[%s1183_s15 + $0x58] sm:$0xff]  ;;  %v1294_v3 = vld [vmem:[%s1493_s2] ss:$0 sm:$0xff] }
  0x1a   : > { %262 = vmatpush.msra.mxu0 %v191_v21  ;;  %1010 = vmatpush.msra.mxu3 %v191_v21  ;;  %v440_v21 = vand.u32 15, %v402_v15 }
  0x1b   : > { %347 = vmatpush.msra.mxu1 %v961_v22  ;;  %751 = vmatpush.msra.mxu2 %v952_v23 }
  0x1c   : > { %263 = vmatpush.msra.mxu0 %v190_v24  ;;  %1011 = vmatpush.msra.mxu3 %v190_v24  ;;  %vm675_vm6 = vcmp.eq.s32.totalorder %v440_v21, 15 }
  0x1d   : > { %348 = vmatpush.msra.mxu1 %v960_v25  ;;  %752 = vmatpush.msra.mxu2 %v951_v26 }
  0x1e   : > { %935 = vmatmul.msk.f32.vlgmr.msra.gmra.mxu0 %vm199_vm0, %v174_v27  ;;  %947 = vmatmul.msk.f32.vlgmr.msra.gmra.mxu3 %vm199_vm0, %v1196_v28 }
  0x1f   : > { %1012 = vmatpush.msrb.mxu3 %v1081_v1  ;;  %969 = vmatmul.msk.f32.vlgmr.msra.gmra.mxu1 %vm199_vm0, %v174_v27 }
  0x20   : > { %985 = vmatmul.msk.f32.vlgmr.msra.gmra.mxu2 %vm199_vm0, %v174_v27 }
  0x21   : > { %1013 = vmatpush.msrb.mxu3 %v1094_v4 }
  0x23   : > { %1014 = vmatpush.msrb.mxu3 %v1109_v7 }
  0x25   : > { %1015 = vmatpush.msrb.mxu3 %v965_v10 }
  0x26   : > { %936 = vmatmul.msk.f32.gmra.mxu0 %vm199_vm0, %v175_v29  ;;  %948 = vmatmul.msk.f32.gmra.mxu3 %vm199_vm0, %v187_v30 }
  0x27   : > { %970 = vmatmul.msk.f32.gmra.mxu1 %vm199_vm0, %v175_v29  ;;  %1016 = vmatpush.msrb.mxu3 %v964_v13 }
  0x28   : > { %986 = vmatmul.msk.f32.gmra.mxu2 %vm199_vm0, %v175_v29 }
  0x29   : > { %1017 = vmatpush.msrb.mxu3 %v963_v16 }
  0x2b   : > { %1018 = vmatpush.msrb.mxu3 %v962_v19 }
  0x2d   : > { %1019 = vmatpush.msrb.mxu3 %v961_v22  ;;  %v403_v22 = vadd.s32 32, %v1276_v49 }
  0x2e   : > { %937 = vmatmul.msk.f32.gmra.mxu0 %vm199_vm0, %v176_v31  ;;  %949 = vmatmul.msk.f32.gmra.mxu3 %vm199_vm0, %v188_v32 }
  0x2f   : > { %971 = vmatmul.msk.f32.gmra.mxu1 %vm199_vm0, %v176_v31  ;;  %1020 = vmatpush.msrb.mxu3 %v960_v25 }
  0x30   : > { %987 = vmatmul.msk.f32.gmra.mxu2 %vm199_vm0, %v176_v31 }
  0x31   : > { %1021 = vmatpush.msra.mxu3 %v1086_v2 }
  0x33   : > { %1022 = vmatpush.msra.mxu3 %v1099_v5 }
  0x35   : > { %1023 = vmatpush.msra.mxu3 %v1114_v8 }
  0x36   : > { %938 = vmatmul.msk.f32.gmra.mxu0 %vm199_vm0, %v177_v33  ;;  %950 = vmatmul.msk.f32.gmra.mxu3 %vm199_vm0, %v189_v34 }
  0x37   : > { %972 = vmatmul.msk.f32.gmra.mxu1 %vm199_vm0, %v177_v33  ;;  %1024 = vmatpush.msra.mxu3 %v1127_v11 }
  0x38   : > { %988 = vmatmul.msk.f32.gmra.mxu2 %vm199_vm0, %v177_v33 }
  0x39   : > { %1025 = vmatpush.msra.mxu3 %v1143_v14 }
  0x3b   : > { %1026 = vmatpush.msra.mxu3 %v1155_v17  ;;  %v419_v17 = vand.u32 15, %v1276_v49 }
  0x3d   : > { %1027 = vmatpush.msra.mxu3 %v953_v20  ;;  %vm607_vm5 = vcmp.eq.s32.totalorder %v419_v17, 0 }
  0x3e   : > { %939 = vmatmul.msk.f32.gmra.mxu0 %vm199_vm0, %v178_v35  ;;  %981 = vmatmul.msk.f32.vlgmr.msrb.gmra.mxu3 %vm199_vm0, %v1196_v28 }
  0x3f   : > { %973 = vmatmul.msk.f32.gmra.mxu1 %vm199_vm0, %v178_v35  ;;  %1028 = vmatpush.msra.mxu3 %v952_v23 }
  0x40   : > { %989 = vmatmul.msk.f32.gmra.mxu2 %vm199_vm0, %v178_v35 }
  0x41   : > { %1029 = vmatpush.msra.mxu3 %v951_v26 }
  0x46   : > { %940 = vmatmul.msk.f32.gmra.mxu0 %vm199_vm0, %v179_v36  ;;  %982 = vmatmul.msk.f32.gmra.mxu3 %vm199_vm0, %v187_v30 }
  0x47   : > { %974 = vmatmul.msk.f32.gmra.mxu1 %vm199_vm0, %v179_v36 }
  0x48   : > { %990 = vmatmul.msk.f32.gmra.mxu2 %vm199_vm0, %v179_v36 }
  0x4e   : > { %941 = vmatmul.msk.f32.gmra.mxu0 %vm199_vm0, %v180_v37  ;;  %983 = vmatmul.msk.f32.gmra.mxu3 %vm199_vm0, %v188_v32 }
  0x4f   : > { %975 = vmatmul.msk.f32.gmra.mxu1 %vm199_vm0, %v180_v37 }
  0x50   : > { %991 = vmatmul.msk.f32.gmra.mxu2 %vm199_vm0, %v180_v37  ;;  %v447_v37 = vand.u32 15, %v403_v22 }
  0x52   : > { %vm611_vm7 = vcmp.eq.s32.totalorder %v447_v37, 0 }
  0x56   : > { %942 = vmatmul.msk.f32.gmra.mxu0 %vm199_vm0, %v181_v38  ;;  %984 = vmatmul.msk.f32.gmra.mxu3 %vm199_vm0, %v189_v34 }
  0x57   : > { %976 = vmatmul.msk.f32.gmra.mxu1 %vm199_vm0, %v181_v38 }
  0x58   : > { %992 = vmatmul.msk.f32.gmra.mxu2 %vm199_vm0, %v181_v38 }
  0x5e   : > { %943 = vmatmul.msk.f32.gmra.mxu0 %vm199_vm0, %v182_v39  ;;  %997 = vmatmul.msk.f32.vlgmr.msra.gmra.mxu3 %vm199_vm0, %v1196_v28 }
  0x5f   : > { %977 = vmatmul.msk.f32.gmra.mxu1 %vm199_vm0, %v182_v39 }
  0x60   : > { %993 = vmatmul.msk.f32.gmra.mxu2 %vm199_vm0, %v182_v39 }
  0x66   : > { %944 = vmatmul.msk.f32.gmra.mxu0 %vm199_vm0, %v183_v40  ;;  %998 = vmatmul.msk.f32.gmra.mxu3 %vm199_vm0, %v187_v30 }
  0x67   : > { %978 = vmatmul.msk.f32.gmra.mxu1 %vm199_vm0, %v183_v40 }
  0x68   : > { %994 = vmatmul.msk.f32.gmra.mxu2 %vm199_vm0, %v183_v40 }
  0x6e   : > { %945 = vmatmul.msk.f32.gmra.mxu0 %vm199_vm0, %v184_v41  ;;  %999 = vmatmul.msk.f32.gmra.mxu3 %vm199_vm0, %v188_v32 }
  0x6f   : > { %979 = vmatmul.msk.f32.gmra.mxu1 %vm199_vm0, %v184_v41 }
  0x70   : > { %995 = vmatmul.msk.f32.gmra.mxu2 %vm199_vm0, %v184_v41 }
  0x76   : > { %946 = vmatmul.msk.f32.gmra.mxu0 %vm199_vm0, %v185_v42  ;;  %1000 = vmatmul.msk.f32.gmra.mxu3 %vm199_vm0, %v189_v34 }
  0x77   : > { %980 = vmatmul.msk.f32.gmra.mxu1 %vm199_vm0, %v185_v42 }
  0x78   : > { %996 = vmatmul.msk.f32.gmra.mxu2 %vm199_vm0, %v185_v42 }
  0x9b   : > { %v265_v43 = vpop.f32.mrf.mxu0 }
  0x9c   : > { %v1272_v44 = vpop.f32.mrf.mxu1  ;;  %v623_v58 = vrot.slane %v265_v43, 7 }
  0x9d   : > { %v688_v31 = vrot.slane %v1272_v44, 1 }
  0xa1   : > { %v1274_v46 = vpop.f32.mrf.mxu3 }
  0xa3   : > { %v754_v47 = vpop.f32.mrf.mxu2  ;;  %v268_v48 = vpop.f32.mrf.mxu0 }
  0xa4   : > { %v1278_v50 = vpop.f32.mrf.mxu1  ;;  %v624_v54 = vrot.slane %v268_v48, 7 }
  0xa5   : > { %v689_v60 = vrot.slane %v1278_v50, 1 }
  0xa6   : > { %v654_v62 = vsel %vm639_vm1, %v623_v58, %v624_v54 }
  0xa7   : > { %v719_v38 = vsel %vm704_vm3, %v688_v31, %v689_v60 }
  0xa9   : > { %v1281_v52 = vpop.f32.mrf.mxu3 }
  0xab   : > { %v757_v56 = vpop.f32.mrf.mxu2  ;;  %v271_v57 = vpop.f32.mrf.mxu0 }
  0xac   : > { %v356_v59 = vpop.f32.mrf.mxu1  ;;  %v625_v63 = vrot.slane %v271_v57, 7  ;;  %v758_v1 = vadd.f32 %v757_v56, %v654_v62 }
  0xad   : > { %v690_v61 = vrot.slane %v356_v59, 1  ;;  %v404_v59 = vadd.s32 40, %v1276_v49 }
  0xae   : > { %v653_v7 = vsel %vm639_vm1, %v624_v54, %v625_v63 }
  0xaf   : > { %v718_v2 = vsel %vm704_vm3, %v689_v60, %v690_v61  ;;  %v658_v13 = vsel %vm609_vm4, 0.0, %v653_v7  ;;  %v454_v0 = vand.u32 15, %v404_v59 }
  0xb0   : > { %v722_v4 = vsel %vm673_vm2, 0.0, %v718_v2 }
  0xb1   : > { %v803_v5 = vadd.f32 %v758_v1, %v722_v4  ;;  %v1296_v6 = vpop.f32.mrf.mxu3  ;;  %v405_v4 = vadd.s32 48, %v1276_v49  ;;  %vm677_vm8 = vcmp.eq.s32.totalorder %v454_v0, 15 }
  0xb3   : > { %v823_v8 = vadd.f32 %v1294_v3, %v803_v5  ;;  %v760_v9 = vpop.f32.mrf.mxu2  ;;  %v274_v10 = vpop.f32.mrf.mxu0 }
  0xb4   : > { %v359_v11 = vpop.f32.mrf.mxu1  ;;  %v761_v16 = vadd.f32 %v760_v9, %v658_v13  ;;  %v626_v23 = vrot.slane %v274_v10, 7  ;;  %v461_v13 = vand.u32 15, %v405_v4  ;;  %v413_v4 = vadd.s32 112, %v1276_v49 }
  0xb5   : > { %v839_v12 = vmax.f32 %v823_v8, 0.0  ;;  %v691_v14 = vrot.slane %v359_v11, 1 }
  0xb6   : > { %v652_v35 = vsel %vm639_vm1, %v625_v63, %v626_v23  ;;  %vm613_vm9 = vcmp.eq.s32.totalorder %v461_v13, 0 }
  0xb7   : > { %855 = vst [vmem:[%s1306_s27 + $0x8] sm:$0xff] %v839_v12  ;;  %v717_v18 = vsel %vm704_vm3, %v690_v61, %v691_v14 }
  0xb8   : > { %v804_v19 = vadd.f32 %v761_v16, %v717_v18 }
  0xb9   : > { %v1313_v20 = vpop.f32.mrf.mxu3 }
  0xba   : > { %v824_v24 = vadd.f32 %v1294_v3, %v804_v19  ;;  %v638_v25 = vrot.slane %v1313_v20, 7 }
  0xbb   : > { %v763_v26 = vpop.f32.mrf.mxu2  ;;  %v277_v27 = vpop.f32.mrf.mxu0 }
  0xbc   : > { %v840_v28 = vmax.f32 %v824_v24, 0.0  ;;  %v655_v29 = vsel %vm639_vm1, %v638_v25, %v623_v58  ;;  %v362_v30 = vpop.f32.mrf.mxu1  ;;  %v627_v36 = vrot.slane %v277_v27, 7  ;;  %v764_v39 = vadd.f32 %v763_v26, %v652_v35 }
  0xbd   : > { %v656_v32 = vsel %vm607_vm5, 0.0, %v655_v29  ;;  %v692_v33 = vrot.slane %v362_v30, 1  ;;  %v406_v29 = vadd.s32 56, %v1276_v49 }
  0xbe   : > { %856 = vst [vmem:[%s1306_s27 + $0x10] sm:$0xff] %v840_v28  ;;  %v755_v34 = vadd.f32 %v754_v47, %v656_v32  ;;  %v651_v48 = vsel %vm639_vm1, %v626_v23, %v627_v36 }
  0xbf   : > { %v716_v40 = vsel %vm704_vm3, %v691_v14, %v692_v33  ;;  %v660_v57 = vsel %vm611_vm7, 0.0, %v651_v48  ;;  %v468_v35 = vand.u32 15, %v406_v29 }
  0xc0   : > { %v802_v41 = vadd.f32 %v755_v34, %v719_v38  ;;  %v724_v42 = vsel %vm675_vm6, 0.0, %v716_v40  ;;  %v407_v38 = vadd.s32 64, %v1276_v49 }
  0xc1   : > { %v805_v43 = vadd.f32 %v764_v39, %v724_v42  ;;  %v1332_v45 = vpop.f32.mrf.mxu3  ;;  %vm679_vm10 = vcmp.eq.s32.totalorder %v468_v35, 15 }
  0xc2   : > { %v822_v47 = vadd.f32 %v1294_v3, %v802_v41 }
  0xc3   : > { %v825_v50 = vadd.f32 %v1294_v3, %v805_v43  ;;  %v766_v51 = vpop.f32.mrf.mxu2  ;;  %v280_v53 = vpop.f32.mrf.mxu0 }
  0xc4   : > { %v838_v54 = vmax.f32 %v822_v47, 0.0  ;;  %v365_v55 = vpop.f32.mrf.mxu1  ;;  %v767_v60 = vadd.f32 %v766_v51, %v660_v57  ;;  %v628_v1 = vrot.slane %v280_v53, 7 }
  0xc5   : > { %v841_v56 = vmax.f32 %v825_v50, 0.0  ;;  %v693_v58 = vrot.slane %v365_v55, 1  ;;  %v475_v50 = vand.u32 15, %v407_v38  ;;  %v412_v55 = vadd.s32 104, %v1276_v49 }
  0xc6   : > { %854 = vst [vmem:[%s1306_s27] sm:$0xff] %v838_v54  ;;  %v650_v11 = vsel %vm639_vm1, %v627_v36, %v628_v1 }
  0xc7   : > { %857 = vst [vmem:[%s1306_s27 + $0x18] sm:$0xff] %v841_v56  ;;  %v715_v61 = vsel %vm704_vm3, %v692_v33, %v693_v58  ;;  %vm615_vm11 = vcmp.eq.s32.totalorder %v475_v50, 0  ;;  %v414_v50 = vadd.s32 120, %v1276_v49 }
  0xc8   : > { %v806_v62 = vadd.f32 %v767_v60, %v715_v61 }
  0xc9   : > { %v1343_v63 = vpop.f32.mrf.mxu3 }
  0xca   : > { %v826_v2 = vadd.f32 %v1294_v3, %v806_v62  ;;  %v636_v62 = vrot.slane %v1281_v52, 7 }
  0xcb   : > { %v769_v5 = vpop.f32.mrf.mxu2  ;;  %v283_v7 = vpop.f32.mrf.mxu0 }
  0xcc   : > { %v842_v8 = vmax.f32 %v826_v2, 0.0  ;;  %v368_v9 = vpop.f32.mrf.mxu1  ;;  %v629_v12 = vrot.slane %v283_v7, 7  ;;  %v770_v14 = vadd.f32 %v769_v5, %v650_v11  ;;  %v510_v2 = vand.u32 15, %v412_v55 }
  0xcd   : > { %v694_v10 = vrot.slane %v368_v9, 1  ;;  %v408_v9 = vadd.s32 72, %v1276_v49 }
  0xce   : > { %858 = vst [vmem:[%s1306_s27 + $0x20] sm:$0xff] %v842_v8  ;;  %v649_v19 = vsel %vm639_vm1, %v628_v1, %v629_v12  ;;  %vm685_vm12 = vcmp.eq.s32.totalorder %v510_v2, 15 }
  0xcf   : > { %v714_v15 = vsel %vm704_vm3, %v693_v58, %v694_v10  ;;  %v662_v27 = vsel %vm613_vm9, 0.0, %v649_v19  ;;  %v517_v19 = vand.u32 15, %v413_v4  ;;  %v524_v4 = vand.u32 15, %v414_v50 }
  0xd0   : > { %v726_v16 = vsel %vm677_vm8, 0.0, %v714_v15  ;;  %v637_v15 = vrot.slane %v1296_v6, 7 }
  0xd1   : > { %v807_v17 = vadd.f32 %v770_v14, %v726_v16  ;;  %v1352_v18 = vpop.f32.mrf.mxu3  ;;  %vm1401_vm14 = vcmp.eq.s32.totalorder %v517_v19, 0  ;;  %vm1448_vm2 = vcmp.eq.s32.totalorder %v524_v4, 15 }
  0xd2   : > { %v702_v0 = vrot.slane %v1352_v18, 1  ;;  %v482_v18 = vand.u32 15, %v408_v9 }
  0xd3   : > { %v827_v21 = vadd.f32 %v1294_v3, %v807_v17  ;;  %v772_v22 = vpop.f32.mrf.mxu2  ;;  %v286_v23 = vpop.f32.mrf.mxu0 }
  0xd4   : > { %v371_v24 = vpop.f32.mrf.mxu1  ;;  %v773_v30 = vadd.f32 %v772_v22, %v662_v27  ;;  %v630_v36 = vrot.slane %v286_v23, 7  ;;  %v409_v23 = vadd.s32 80, %v1276_v49  ;;  %vm1397_vm13 = vcmp.eq.s32.totalorder %v482_v18, 15 }
  0xd5   : > { %v843_v26 = vmax.f32 %v827_v21, 0.0  ;;  %v695_v28 = vrot.slane %v371_v24, 1  ;;  %v700_v18 = vrot.slane %v1332_v45, 1 }
  0xd6   : > { %v648_v47 = vsel %vm639_vm1, %v629_v12, %v630_v36  ;;  %v635_v12 = vrot.slane %v1274_v46, 7 }
  0xd7   : > { %859 = vst [vmem:[%s1306_s27 + $0x28] sm:$0xff] %v843_v26  ;;  %v713_v32 = vsel %vm704_vm3, %v694_v10, %v695_v28  ;;  %v701_v10 = vrot.slane %v1343_v63, 1 }
  0xd8   : > { %v808_v33 = vadd.f32 %v773_v30, %v713_v32  ;;  %v642_v16 = vsel %vm639_vm1, %v635_v12, %v636_v62  ;;  %v411_v32 = vadd.s32 96, %v1276_v49 }
  0xd9   : > { %v1361_v34 = vpop.f32.mrf.mxu3  ;;  %v706_v14 = vsel %vm704_vm3, %v701_v10, %v702_v0 }
  0xda   : > { %v828_v37 = vadd.f32 %v1294_v3, %v808_v33  ;;  %v734_v26 = vsel %vm685_vm12, 0.0, %v706_v14 }
  0xdb   : > { %v775_v39 = vpop.f32.mrf.mxu2  ;;  %v289_v40 = vpop.f32.mrf.mxu0 }
  0xdc   : > { %v844_v41 = vmax.f32 %v828_v37, 0.0  ;;  %v374_v42 = vpop.f32.mrf.mxu1  ;;  %v631_v48 = vrot.slane %v289_v40, 7  ;;  %v776_v51 = vadd.f32 %v775_v39, %v648_v47  ;;  %v641_v37 = vsel %vm639_vm1, %v636_v62, %v637_v15 }
  0xdd   : > { %v696_v43 = vrot.slane %v374_v42, 1  ;;  %v703_v42 = vrot.slane %v1361_v34, 1 }
  0xde   : > { %860 = vst [vmem:[%s1306_s27 + $0x30] sm:$0xff] %v844_v41  ;;  %v647_v58 = vsel %vm639_vm1, %v630_v36, %v631_v48  ;;  %v489_v41 = vand.u32 15, %v409_v23 }
  0xdf   : > { %v712_v53 = vsel %vm704_vm3, %v695_v28, %v696_v43  ;;  %v664_v7 = vsel %vm615_vm11, 0.0, %v647_v58  ;;  %v410_v58 = vadd.s32 88, %v1276_v49  ;;  %v720_v45 = vsel %vm704_vm3, %v703_v42, %v688_v31 }
  0xe0   : > { %v728_v54 = vsel %vm679_vm10, 0.0, %v712_v53  ;;  %vm1424_vm15 = vcmp.eq.s32.totalorder %v489_v41, 0  ;;  %v736_v6 = vsel %vm1448_vm2, 0.0, %v720_v45 }
  0xe1   : > { %v809_v56 = vadd.f32 %v776_v51, %v728_v54  ;;  %v1371_v57 = vpop.f32.mrf.mxu3  ;;  %v503_v54 = vand.u32 15, %v411_v32  ;;  %v496_v14 = vand.u32 15, %v410_v58 }
  0xe3   : > { %v829_v59 = vadd.f32 %v1294_v3, %v809_v56  ;;  %v778_v60 = vpop.f32.mrf.mxu2  ;;  %v292_v61 = vpop.f32.mrf.mxu0  ;;  %vm1433_vm0 = vcmp.eq.s32.totalorder %v503_v54, 0  ;;  %vm1461_vm4 = vcmp.eq.s32.totalorder %v496_v14, 15 }
  0xe4   : > { %v377_v1 = vpop.f32.mrf.mxu1  ;;  %v779_v11 = vadd.f32 %v778_v60, %v664_v7  ;;  %v632_v46 = vrot.slane %v292_v61, 7 }
  0xe5   : > { %v845_v5 = vmax.f32 %v829_v59, 0.0  ;;  %v697_v8 = vrot.slane %v377_v1, 1  ;;  %v705_v1 = vsel %vm704_vm3, %v702_v0, %v703_v42 }
  0xe6   : > { %v646_v38 = vsel %vm639_vm1, %v631_v48, %v632_v46  ;;  %v670_v48 = vsel %vm1401_vm14, 0.0, %v641_v37 }
  0xe7   : > { %861 = vst [vmem:[%s1306_s27 + $0x38] sm:$0xff] %v845_v5  ;;  %v711_v52 = vsel %vm704_vm3, %v696_v43, %v697_v8 }
  0xe8   : > { %v810_v13 = vadd.f32 %v779_v11, %v711_v52 }
  0xe9   : > { %v793_v17 = vpop.f32.mrf.mxu3 }
  0xea   : > { %v830_v21 = vadd.f32 %v1294_v3, %v810_v13  ;;  %v794_v22 = vadd.f32 %v793_v17, %v642_v16 }
  0xeb   : > { %v781_v24 = vpop.f32.mrf.mxu2  ;;  %v1394_v27 = vpop.f32.mrf.mxu0 }
  0xec   : > { %v846_v28 = vmax.f32 %v830_v21, 0.0  ;;  %v815_v29 = vadd.f32 %v794_v22, %v734_v26  ;;  %v380_v30 = vpop.f32.mrf.mxu1  ;;  %v633_v40 = vrot.slane %v1394_v27, 7  ;;  %v782_v43 = vadd.f32 %v781_v24, %v646_v38 }
  0xed   : > { %v698_v35 = vrot.slane %v380_v30, 1 }
  0xee   : > { %862 = vst [vmem:[%s1306_s27 + $0x40] sm:$0xff] %v846_v28  ;;  %v835_v39 = vadd.f32 %v1294_v3, %v815_v29  ;;  %v645_v59 = vsel %vm639_vm1, %v632_v46, %v633_v40 }
  0xef   : > { %v710_v47 = vsel %vm704_vm3, %v697_v8, %v698_v35  ;;  %v666_v52 = vsel %vm1424_vm15, 0.0, %v645_v59 }
  0xf0   : > { %v851_v51 = vmax.f32 %v835_v39, 0.0  ;;  %v730_v53 = vsel %vm1397_vm13, 0.0, %v710_v47 }
  0xf1   : > { %v811_v55 = vadd.f32 %v782_v43, %v730_v53  ;;  %v796_v56 = vpop.f32.mrf.mxu3 }
  0xf2   : > { %867 = vst [vmem:[%s1306_s27 + $0x68] sm:$0xff] %v851_v51  ;;  %v797_v60 = vadd.f32 %v796_v56, %v670_v48 }
  0xf3   : > { %v831_v61 = vadd.f32 %v1294_v3, %v811_v55  ;;  %v784_v62 = vpop.f32.mrf.mxu2  ;;  %v298_v2 = vpop.f32.mrf.mxu0 }
  0xf4   : > { %v816_v5 = vadd.f32 %v797_v60, %v705_v1  ;;  %v634_v8 = vrot.slane %v298_v2, 7  ;;  %v383_v9 = vpop.f32.mrf.mxu1  ;;  %v785_v16 = vadd.f32 %v784_v62, %v666_v52 }
  0xf5   : > { %v847_v11 = vmax.f32 %v831_v61, 0.0  ;;  %v699_v13 = vrot.slane %v383_v9, 1 }
  0xf6   : > { %v836_v17 = vadd.f32 %v1294_v3, %v816_v5  ;;  %v643_v0 = vsel %vm639_vm1, %v634_v8, %v635_v12  ;;  %v707_v12 = vsel %vm704_vm3, %v700_v18, %v701_v10  ;;  %v644_v28 = vsel %vm639_vm1, %v633_v40, %v634_v8 }
  0xf7   : > { %863 = vst [vmem:[%s1306_s27 + $0x48] sm:$0xff] %v847_v11  ;;  %v668_v19 = vsel %vm1433_vm0, 0.0, %v643_v0  ;;  %v709_v46 = vsel %vm704_vm3, %v698_v35, %v699_v13  ;;  %v708_v63 = vsel %vm704_vm3, %v699_v13, %v700_v18 }
  0xf8   : > { %v852_v22 = vmax.f32 %v836_v17, 0.0  ;;  %v791_v23 = vadd.f32 %v1371_v57, %v668_v19  ;;  %v812_v24 = vadd.f32 %v785_v16, %v709_v46  ;;  %v640_v57 = vsel %vm639_vm1, %v637_v15, %v638_v25 }
  0xf9   : > { %v799_v44 = vpop.f32.mrf.mxu3  ;;  %v732_v32 = vsel %vm1461_vm4, 0.0, %v708_v63 }
  0xfa   : > { %868 = vst [vmem:[%s1306_s27 + $0x70] sm:$0xff] %v852_v22  ;;  %v814_v31 = vadd.f32 %v791_v23, %v707_v12  ;;  %v832_v10 = vadd.f32 %v1294_v3, %v812_v24  ;;  %v800_v27 = vadd.f32 %v799_v44, %v640_v57 }
  0xfb   : > { %v787_v20 = vpop.f32.mrf.mxu2 }
  0xfc   : > { %v834_v25 = vadd.f32 %v1294_v3, %v814_v31  ;;  %v848_v15 = vmax.f32 %v832_v10, 0.0  ;;  %v788_v29 = vadd.f32 %v787_v20, %v644_v28  ;;  %v817_v30 = vadd.f32 %v800_v27, %v736_v6 }
  0xfe   : > { %v850_v33 = vmax.f32 %v834_v25, 0.0  ;;  %864 = vst [vmem:[%s1306_s27 + $0x50] sm:$0xff] %v848_v15  ;;  %v813_v35 = vadd.f32 %v788_v29, %v732_v32  ;;  %v837_v49 = vadd.f32 %v1294_v3, %v817_v30 }
 0x100   : > { %866 = vst [vmem:[%s1306_s27 + $0x60] sm:$0xff] %v850_v33  ;;  %v833_v36 = vadd.f32 %v1294_v3, %v813_v35  ;;  %v853_v37 = vmax.f32 %v837_v49, 0.0 }
 0x102   : > { %v849_v38 = vmax.f32 %v833_v36, 0.0  ;;  %869 = vst [vmem:[%s1306_s27 + $0x78] sm:$0xff] %v853_v37 }
 0x104   : > { %865 = vst [vmem:[%s1306_s27 + $0x58] sm:$0xff] %v849_v38 }
 0x105 PF: > { %s13_s12 = sadd.s32 1, %s1045_s12  }
 0x106   : > { %p10_p4 = scmp.ge.s32.totalorder %s13_s12, 4  }
 0x108   :  { %12 = sbr.rel (!%p10_p4) target bundleno = 1 (0x1), region = 64 }

</bundles_post_ra>
